<compile_context>
chip_gen: v6e
topology: v6e:2x2x1
jax: 0.10.0
libtpu: 0.0.40
codegen_flags: <defaults>
</compile_context>

<pallas_src>
import functools

import jax
import jax.numpy as jnp
from jax import lax
from jax.experimental import pallas as pl
from jax.experimental.pallas import tpu as pltpu


def _round_up(n, m):
    return ((n + m - 1) // m) * m


def _cdiv(a, b):
    return -(-a // b)


def _elementwise_dtype():
    """bf16 element-wise math on v6e/v7x; f32 on older chips (no bf16 VPU)."""
    try:
        kind = jax.devices()[0].device_kind.lower()
    except Exception:
        return jnp.bfloat16
    if any(v in kind for v in ("v2", "v3", "v4", "v5")):
        return jnp.float32
    return jnp.bfloat16


def _select_tile(B, tile_b):
    """Lane-aligned batch tile, sized for the HBM roofline and v7x megacore."""
    tile = min(int(tile_b), _round_up(B, 128))
    tile = max(128, (tile // 128) * 128)
    if B >= 4 * 1024:
        # Target an even number of >=4 grid steps (v7x: 2 TCs, each gets >=2
        # pipelined steps) while keeping every step >=1024 rows so the
        # ~0.35 us/step overhead stays amortized.  On 1-TC chips (v5e/v6e) the
        # extra steps cost <1% at these tile sizes.
        n = _cdiv(B, tile)
        target = max(4, n + (n % 2))
        cand = max(1024, _round_up(_cdiv(B, target), 128))
        if _cdiv(B, cand) >= 4:
            tile = min(tile, cand)
    return tile


def wdis_kernel(x_ref, w1_ref, b1_ref, w2_ref, b2_ref, w3_ref, b3_ref, o_ref):
    # x_ref : [tile_b, d_in] f32   (natural layout, streamed straight from HBM)
    # w*_ref: PyTorch [out, in] layout, bf16 (resident across grid steps)
    # b1/b2 : [out, 1] in the element-wise compute dtype; b3: [1, 1] f32
    xt = x_ref[...].astype(jnp.bfloat16)                                     # bf16 MXU operand

    # W1 @ x.T : contract both `in` axes -> feature-major [d1, tile_b] (batch on lanes).
    h1 = lax.dot_general(
        w1_ref[...], xt,
        dimension_numbers=(((1,), (1,)), ((), ())),
        preferred_element_type=jnp.float32,
    )
    h1 = jnp.maximum(h1.astype(b1_ref.dtype) + b1_ref[...], 0)              # bias + ReLU (VPU)
    h1 = h1.astype(jnp.bfloat16)

    h2 = jnp.dot(w2_ref[...], h1, preferred_element_type=jnp.float32)       # [d2, tile_b]
    h2 = jnp.maximum(h2.astype(b2_ref.dtype) + b2_ref[...], 0)
    h2 = h2.astype(jnp.bfloat16)

    logits = jnp.dot(w3_ref[...], h2, preferred_element_type=jnp.float32)   # [1, tile_b]
    logits = logits + b3_ref[...]

    # Sigmoid: exp and approximate reciprocal both run on the (otherwise idle) EUP slot.
    sig = pl.reciprocal(1.0 + jnp.exp(-logits), approx=True)

    o_ref[...] = sig.astype(o_ref.dtype)                                    # lane-dense [1, tile_b] store


@functools.partial(jax.jit, static_argnames=("tile_b",))
def wdis_forward(x, w1, b1, w2, b2, w3, b3, *, tile_b=16384):
    """Forward pass of Wdis.

    x:  [B, img_dim] f32
    w1: [dim1, img_dim], b1: [dim1]       (PyTorch nn.Linear layout: W is [out, in])
    w2: [dim2, dim1],    b2: [dim2]
    w3: [1, dim2],       b3: [1]
    returns [B, 1] f32 in (0, 1).
    """
    B, d_in = x.shape
    d1 = w1.shape[0]
    d2 = w2.shape[0]

    tile = _select_tile(B, tile_b)
    grid_n = _cdiv(B, tile)
    B_pad = grid_n * tile  # only the OUTPUT is over-allocated; x stays unpadded.

    # Resident bf16 weights; biases in the element-wise compute dtype (bf16 on
    # v6e/v7x, f32 on v5e); b3 stays f32 so the sigmoid input is f32.
    ew = _elementwise_dtype()
    w1b = w1.astype(jnp.bfloat16)
    w2b = w2.astype(jnp.bfloat16)
    w3b = w3.astype(jnp.bfloat16)
    b1c = b1.astype(ew).reshape(d1, 1)
    b2c = b2.astype(ew).reshape(d2, 1)
    b3c = b3.astype(jnp.float32).reshape(1, 1)

    cost = pl.CostEstimate(
        flops=int(2 * B_pad * (d_in * d1 + d1 * d2 + d2)),
        transcendentals=int(2 * B_pad),  # exp + approx reciprocal
        bytes_accessed=int(
            B * d_in * 4 + B_pad * 4
            + (w1b.size + w2b.size + w3b.size) * 2
            + (b1c.size + b2c.size + b3c.size) * 4
        ),
    )

    out_row = pl.pallas_call(
        wdis_kernel,
        out_shape=jax.ShapeDtypeStruct((1, B_pad), jnp.float32),
        grid_spec=pltpu.PrefetchScalarGridSpec(
            num_scalar_prefetch=0,
            grid=(grid_n,),
            in_specs=[
                pl.BlockSpec((tile, d_in), lambda i: (i, 0)),   # x, natural layout (ragged tail masked)
                pl.BlockSpec((d1, d_in), lambda i: (0, 0)),     # W1 (resident)
                pl.BlockSpec((d1, 1), lambda i: (0, 0)),        # b1
                pl.BlockSpec((d2, d1), lambda i: (0, 0)),       # W2
                pl.BlockSpec((d2, 1), lambda i: (0, 0)),        # b2
                pl.BlockSpec((1, d2), lambda i: (0, 0)),        # W3
                pl.BlockSpec((1, 1), lambda i: (0, 0)),         # b3
            ],
            out_specs=pl.BlockSpec((1, tile), lambda i: (0, i)),  # lane-dense output slab
        ),
        compiler_params=pltpu.CompilerParams(
            dimension_semantics=("parallel",),
            vmem_limit_bytes=32 * 1024 * 1024,  # lifts v5e's 16 MiB scoped default; safe on v7x's 64 MiB
        ),
        cost_estimate=cost,
    )(x, w1b, b1c, w2b, b2c, w3b, b3c)

    # [1, B_pad] -> [B, 1]; padded tail lanes (unspecified values) are dropped here.
    return out_row.reshape(B_pad, 1)[:B]


def wdis_reference(x, w1, b1, w2, b2, w3, b3):
    h1 = jax.nn.relu(x @ w1.T + b1)
    h2 = jax.nn.relu(h1 @ w2.T + b2)
    return jax.nn.sigmoid(h2 @ w3.T + b3)


if __name__ == "__main__":
    # Small shapes implied by the module (args.img_dim, args.dim1, args.dim2).
    B, IMG_DIM, DIM1, DIM2 = 8, 16, 32, 32

    key = jax.random.PRNGKey(0)
    kx, k1, kb1, k2, kb2, k3, kb3 = jax.random.split(key, 7)

    x = jax.random.normal(kx, (B, IMG_DIM), dtype=jnp.float32)

    # PyTorch nn.Linear layout: W [out_features, in_features], b [out_features].
    w1 = jax.random.normal(k1, (DIM1, IMG_DIM), dtype=jnp.float32) * 0.1
    b1 = jax.random.normal(kb1, (DIM1,), dtype=jnp.float32) * 0.1
    w2 = jax.random.normal(k2, (DIM2, DIM1), dtype=jnp.float32) * 0.1
    b2 = jax.random.normal(kb2, (DIM2,), dtype=jnp.float32) * 0.1
    w3 = jax.random.normal(k3, (1, DIM2), dtype=jnp.float32) * 0.1
    b3 = jax.random.normal(kb3, (1,), dtype=jnp.float32) * 0.1

    # Small batch (exercises the min-128 tile with a ragged block + slice-back).
    out = jax.block_until_ready(wdis_forward(x, w1, b1, w2, b2, w3, b3))
    ref = wdis_reference(x, w1, b1, w2, b2, w3, b3)
    assert out.shape == (B, 1)
    assert jnp.allclose(out, ref, atol=2e-2, rtol=2e-2), "Pallas output mismatch vs reference (small batch)"

    # Ragged batch below the multi-step threshold (single grid step, masked tail).
    B2 = 1000
    x2 = jax.random.normal(kx, (B2, IMG_DIM), dtype=jnp.float32)
    out2 = jax.block_until_ready(wdis_forward(x2, w1, b1, w2, b2, w3, b3))
    ref2 = wdis_reference(x2, w1, b1, w2, b2, w3, b3)
    assert out2.shape == (B2, 1)
    assert jnp.allclose(out2, ref2, atol=2e-2, rtol=2e-2), "Pallas output mismatch vs reference (medium batch)"

    # Larger ragged batch (exercises the >=4-even-step parallel grid + ragged tail block).
    B3 = 5000
    x3 = jax.random.normal(kx, (B3, IMG_DIM), dtype=jnp.float32)
    out3 = jax.block_until_ready(wdis_forward(x3, w1, b1, w2, b2, w3, b3))
    ref3 = wdis_reference(x3, w1, b1, w2, b2, w3, b3)
    assert out3.shape == (B3, 1)
    assert jnp.allclose(out3, ref3, atol=2e-2, rtol=2e-2), "Pallas output mismatch vs reference (large batch)"

    print("KERNEL_OK")
</pallas_src>

<mosaic_0001>
module attributes {stable_mosaic.version = 11 : i64} {
  func.func @wdis_kernel(%arg0: i32, %arg1: memref<128x16xf32, #tpu.memory_space<vmem>>, %arg2: memref<32x16xbf16, #tpu.memory_space<vmem>>, %arg3: memref<32x1xbf16, #tpu.memory_space<vmem>>, %arg4: memref<32x32xbf16, #tpu.memory_space<vmem>>, %arg5: memref<32x1xbf16, #tpu.memory_space<vmem>>, %arg6: memref<1x32xbf16, #tpu.memory_space<vmem>>, %arg7: memref<1x1xf32, #tpu.memory_space<vmem>>, %arg8: memref<1x128xf32, #tpu.memory_space<vmem>>) attributes {dimension_semantics = [#tpu.dimension_semantics<parallel>], iteration_bounds = array<i64: 1>, scalar_prefetch = 0 : i64, scratch_operands = 0 : i64, tpu.core_type = #tpu.core_type<tc>, window_params = [{transform_indices = @transform_0, window_bounds = array<i64: 128, 16>}, {pipeline_mode = #tpu.pipeline_mode<synchronous>, transform_indices = @transform_1, window_bounds = array<i64: 32, 16>}, {pipeline_mode = #tpu.pipeline_mode<synchronous>, transform_indices = @transform_2, window_bounds = array<i64: 32, 1>}, {pipeline_mode = #tpu.pipeline_mode<synchronous>, transform_indices = @transform_3, window_bounds = array<i64: 32, 32>}, {pipeline_mode = #tpu.pipeline_mode<synchronous>, transform_indices = @transform_4, window_bounds = array<i64: 32, 1>}, {pipeline_mode = #tpu.pipeline_mode<synchronous>, transform_indices = @transform_5, window_bounds = array<i64: 1, 32>}, {pipeline_mode = #tpu.pipeline_mode<synchronous>, transform_indices = @transform_6, window_bounds = array<i64: 1, 1>}, {transform_indices = @transform_7, window_bounds = array<i64: 1, 128>}]} {
    %c0 = arith.constant 0 : index
    %c0_0 = arith.constant 0 : index
    %0 = vector.load %arg1[%c0, %c0_0] : memref<128x16xf32, #tpu.memory_space<vmem>>, vector<128x16xf32>
    %1 = arith.truncf %0 : vector<128x16xf32> to vector<128x16xbf16>
    %c0_1 = arith.constant 0 : index
    %c0_2 = arith.constant 0 : index
    %2 = vector.load %arg2[%c0_1, %c0_2] : memref<32x16xbf16, #tpu.memory_space<vmem>>, vector<32x16xbf16>
    %cst = arith.constant dense<0.000000e+00> : vector<32x128xf32>
    %3 = tpu.matmul %2, %1, %cst {dimension_numbers = #tpu.dot_dimension_numbers<[1], [1], [0], [0], [0, 0, 1, 0], [], []>} : vector<32x16xbf16>, vector<128x16xbf16>, vector<32x128xf32> -> vector<32x128xf32>
    %4 = arith.truncf %3 : vector<32x128xf32> to vector<32x128xbf16>
    %c0_3 = arith.constant 0 : index
    %c0_4 = arith.constant 0 : index
    %5 = vector.load %arg3[%c0_3, %c0_4] : memref<32x1xbf16, #tpu.memory_space<vmem>>, vector<32x1xbf16>
    %6 = vector.broadcast %5 : vector<32x1xbf16> to vector<32x128xbf16>
    %7 = arith.addf %4, %6 : vector<32x128xbf16>
    %cst_5 = arith.constant 0.000000e+00 : bf16
    %8 = vector.broadcast %cst_5 : bf16 to vector<32x128xbf16>
    %9 = arith.maximumf %7, %8 : vector<32x128xbf16>
    %c0_6 = arith.constant 0 : index
    %c0_7 = arith.constant 0 : index
    %10 = vector.load %arg4[%c0_6, %c0_7] : memref<32x32xbf16, #tpu.memory_space<vmem>>, vector<32x32xbf16>
    %cst_8 = arith.constant dense<0.000000e+00> : vector<32x128xf32>
    %11 = tpu.matmul %10, %9, %cst_8 {dimension_numbers = #tpu.dot_dimension_numbers<[1], [0], [0], [1], [0, 0, 1, 1], [], []>} : vector<32x32xbf16>, vector<32x128xbf16>, vector<32x128xf32> -> vector<32x128xf32>
    %12 = arith.truncf %11 : vector<32x128xf32> to vector<32x128xbf16>
    %c0_9 = arith.constant 0 : index
    %c0_10 = arith.constant 0 : index
    %13 = vector.load %arg5[%c0_9, %c0_10] : memref<32x1xbf16, #tpu.memory_space<vmem>>, vector<32x1xbf16>
    %14 = vector.broadcast %13 : vector<32x1xbf16> to vector<32x128xbf16>
    %15 = arith.addf %12, %14 : vector<32x128xbf16>
    %cst_11 = arith.constant 0.000000e+00 : bf16
    %16 = vector.broadcast %cst_11 : bf16 to vector<32x128xbf16>
    %17 = arith.maximumf %15, %16 : vector<32x128xbf16>
    %c0_12 = arith.constant 0 : index
    %c0_13 = arith.constant 0 : index
    %18 = vector.load %arg6[%c0_12, %c0_13] : memref<1x32xbf16, #tpu.memory_space<vmem>>, vector<1x32xbf16>
    %cst_14 = arith.constant dense<0.000000e+00> : vector<1x128xf32>
    %19 = tpu.matmul %18, %17, %cst_14 {dimension_numbers = #tpu.dot_dimension_numbers<[1], [0], [0], [1], [0, 0, 1, 1], [], []>} : vector<1x32xbf16>, vector<32x128xbf16>, vector<1x128xf32> -> vector<1x128xf32>
    %c0_15 = arith.constant 0 : index
    %c0_16 = arith.constant 0 : index
    %20 = vector.load %arg7[%c0_15, %c0_16] : memref<1x1xf32, #tpu.memory_space<vmem>>, vector<1x1xf32>
    %21 = vector.broadcast %20 : vector<1x1xf32> to vector<1x128xf32>
    %22 = arith.addf %19, %21 : vector<1x128xf32>
    %cst_17 = arith.constant 0.000000e+00 : f32
    %23 = vector.broadcast %cst_17 : f32 to vector<1x128xf32>
    %24 = arith.subf %23, %22 : vector<1x128xf32>
    %25 = math.exp %24 : vector<1x128xf32>
    %cst_18 = arith.constant 1.000000e+00 : f32
    %26 = vector.broadcast %cst_18 : f32 to vector<1x128xf32>
    %27 = arith.addf %26, %25 : vector<1x128xf32>
    %28 = tpu.reciprocal %27 {approx = true} : vector<1x128xf32> -> vector<1x128xf32>
    %c0_19 = arith.constant 0 : index
    %c0_20 = arith.constant 0 : index
    %29 = vector.load %arg8[%c0_19, %c0_20] : memref<1x128xf32, #tpu.memory_space<vmem>>, vector<1x128xf32>
    tpu.vector_store %arg8[%c0_19, %c0_20], %28 {strides = array<i32>} : memref<1x128xf32, #tpu.memory_space<vmem>>, vector<1x128xf32>,
    return
  }
  func.func @transform_0(%arg0: i32) -> (i32, i32) {
    %c0_i32 = arith.constant 0 : i32
    %c0_i32_0 = arith.constant 0 : i32
    return %arg0, %c0_i32 : i32, i32
  }
  func.func @transform_1(%arg0: i32) -> (i32, i32) {
    %c0_i32 = arith.constant 0 : i32
    %c0_i32_0 = arith.constant 0 : i32
    %c0_i32_1 = arith.constant 0 : i32
    return %c0_i32, %c0_i32_0 : i32, i32
  }
  func.func @transform_2(%arg0: i32) -> (i32, i32) {
    %c0_i32 = arith.constant 0 : i32
    %c0_i32_0 = arith.constant 0 : i32
    %c0_i32_1 = arith.constant 0 : i32
    return %c0_i32, %c0_i32_0 : i32, i32
  }
  func.func @transform_3(%arg0: i32) -> (i32, i32) {
    %c0_i32 = arith.constant 0 : i32
    %c0_i32_0 = arith.constant 0 : i32
    %c0_i32_1 = arith.constant 0 : i32
    return %c0_i32, %c0_i32_0 : i32, i32
  }
  func.func @transform_4(%arg0: i32) -> (i32, i32) {
    %c0_i32 = arith.constant 0 : i32
    %c0_i32_0 = arith.constant 0 : i32
    %c0_i32_1 = arith.constant 0 : i32
    return %c0_i32, %c0_i32_0 : i32, i32
  }
  func.func @transform_5(%arg0: i32) -> (i32, i32) {
    %c0_i32 = arith.constant 0 : i32
    %c0_i32_0 = arith.constant 0 : i32
    %c0_i32_1 = arith.constant 0 : i32
    return %c0_i32, %c0_i32_0 : i32, i32
  }
  func.func @transform_6(%arg0: i32) -> (i32, i32) {
    %c0_i32 = arith.constant 0 : i32
    %c0_i32_0 = arith.constant 0 : i32
    %c0_i32_1 = arith.constant 0 : i32
    return %c0_i32, %c0_i32_0 : i32, i32
  }
  func.func @transform_7(%arg0: i32) -> (i32, i32) {
    %c0_i32 = arith.constant 0 : i32
    %c0_i32_0 = arith.constant 0 : i32
    return %c0_i32, %arg0 : i32, i32
  }
}

</mosaic_0001>

<bundles_post_ra>
// kernel: wdis_forward.1
= control target key start
LH: loop header
LB: loop body
LE: loop exit
PB: predicated region body
PF: predicated region fallthrough
CT: control target
= control target key end

     0   :  { %vm67_vm0 = vcmask 130048   ;;  %v509_v3 = vmov 0   ;;  %vm231_vm1 = vcmask 261120   ;;  %v510_v46 = vmov 839922192   ;;  %s673_s0 = inlined_call_operand.vmem [shape: f32[8,16], index: 0, kind: input, shape index: {}]   ;;  %s674_s6 = inlined_call_operand.<no memory space> [shape: f32[1,1], index: 6, kind: input, shape index: {}]   ;;  %s675_s1 = inlined_call_operand.vmem [shape: bf16[32,16], index: 1, kind: input, shape index: {}]   ;;  %s676_s2 = inlined_call_operand.vmem [shape: bf16[32,1], index: 2, kind: input, shape index: {}]   ;;  %s677_s4 = inlined_call_operand.vmem [shape: bf16[32,1], index: 4, kind: input, shape index: {}]   ;;  %s678_s3 = inlined_call_operand.vmem [shape: bf16[32,32], index: 3, kind: input, shape index: {}]   ;;  %s679_s5 = inlined_call_operand.vmem [shape: bf16[1,32], index: 5, kind: input, shape index: {}]   ;;  %s680_s7 = inlined_call_operand.vmem [shape: f32[1,128], index: 7, kind: output, shape index: {}]  }
   0x1   :  { %v43_v0 = vld [vmem:[%s673_s0 + $0x70] sm:$0xff]  ;;  %v44_v1 = vld [vmem:[%s673_s0 + $0x78] sm:$0xff]  ;;  %v41_v2 = vld [vmem:[%s673_s0 + $0x60] sm:$0xff]  ;;  %499 = vset.pattern.permute.xlu0 %v509_v3  ;;  %500 = vset.pattern.permute.xlu1 %v509_v3  ;;  %v12_v4 = vstv %s674_s6  ;;  %v159_v47 = vunpack.c.l.s4 %v510_v46  ;;  %v161_v48 = vlaneseq  ;;  %vm512_vm2 = vmmov 0  }
   0x2   :  { %v52_v5 = vpack.c.bf16 %v44_v1, %v43_v0  ;;  %v42_v6 = vld [vmem:[%s673_s0 + $0x68] sm:$0xff]  ;;  %13 = vst [vmem:[#allocation2] sm:$0x1] %v12_v4  ;;  %v39_v9 = vld [vmem:[%s673_s0 + $0x50] sm:$0xff]  ;;  %v40_v10 = vld [vmem:[%s673_s0 + $0x58] sm:$0xff] }
   0x3   :  { %v51_v7 = vpack.c.bf16 %v42_v6, %v41_v2  ;;  %v501_v11 = vld [vmem:[%s675_s1] sm:$0xff]   ;;  %v151_v12 = vld [vmem:[%s676_s2 + $0x8] sm:$0xf]  ;;  %v50_v15 = vpack.c.bf16 %v40_v10, %v39_v9  ;;  %v152_v16 = vld [vmem:[%s676_s2 + $0xc] sm:$0xf]  ;;  %v160_v49 = vunpack.c.0.s8 %v159_v47  ;;  %v162_v50 = vshrl.u32 %v161_v48, 7 }
   0x4   :  { %487 = vmatprep.subr.msk.bf16.mxu0 %vm67_vm0, %v52_v5  ;;  %v96_v8 = vsel %vm67_vm0, %v52_v5, 0  ;;  %467 = vmatprep.mubr.msk.bf16.mxu0 %vm67_vm0, %v501_v11  ;;  %v149_v13 = vld [vmem:[%s676_s2] sm:$0xf]  ;;  %v150_v17 = vld [vmem:[%s676_s2 + $0x4] sm:$0xf]  ;;  %v38_v20 = vld [vmem:[%s673_s0 + $0x48] sm:$0xff] }
   0x5   :  { %452 = vmatpush3.bf16.xpose.msra.mxu0 %v96_v8  ;;  %179 = vperm.xlu0 %499, %v151_v12   ;;  %v93_v14 = vsel %vm67_vm0, %v51_v7, 0  ;;  %v291_v18 = vld [vmem:[%s677_s4 + $0x8] sm:$0xf]  ;;  %v37_v19 = vld [vmem:[%s673_s0 + $0x40] sm:$0xff]  ;;  %v292_v21 = vld [vmem:[%s677_s4 + $0xc] sm:$0xf]  ;;  %v163_v53 = vsub.s32 %v160_v49, %v162_v50 }
   0x6   :  { %488 = vmatprep.subr.msk.bf16.mxu0 %vm67_vm0, %v51_v7  ;;  %155 = vperm.xlu1 %500, %v149_v13   ;;  %v90_v22 = vsel %vm67_vm0, %v50_v15, 0  ;;  %v49_v23 = vpack.c.bf16 %v38_v20, %v37_v19  ;;  %v289_v24 = vld [vmem:[%s677_s4] sm:$0xf]  ;;  %v290_v25 = vld [vmem:[%s677_s4 + $0x4] sm:$0xf]  ;;  %v35_v27 = vld [vmem:[%s673_s0 + $0x30] sm:$0xff] }
   0x7   :  { %v36_v28 = vld [vmem:[%s673_s0 + $0x38] sm:$0xff]  ;;  %v33_v31 = vld [vmem:[%s673_s0 + $0x20] sm:$0xff]  ;;  %v34_v32 = vld [vmem:[%s673_s0 + $0x28] sm:$0xff]  ;;  %v511_v10 = vmov 0.0  }
   0x8   :  { %v87_v29 = vsel %vm67_vm0, %v49_v23, 0  ;;  %v48_v30 = vpack.c.bf16 %v36_v28, %v35_v27  ;;  %v47_v34 = vpack.c.bf16 %v34_v32, %v33_v31  ;;  %v31_v35 = vld [vmem:[%s673_s0 + $0x10] sm:$0xff]  ;;  %v32_v36 = vld [vmem:[%s673_s0 + $0x18] sm:$0xff]  ;;  %v29_v39 = vld [vmem:[%s673_s0] sm:$0xff]  ;;  %v366_v32 = vsub.s32 0, %v162_v50 }
   0x9   :  { %191 = vperm.xlu0 %499, %v152_v16   ;;  %v358_v26 = vld [vmem:[#allocation2] sm:$0x1]  ;;  %v46_v38 = vpack.c.bf16 %v32_v36, %v31_v35  ;;  %v30_v40 = vld [vmem:[%s673_s0 + $0x8] sm:$0xff] }
   0xa   :  { %167 = vperm.xlu1 %500, %v150_v17   ;;  %v84_v33 = vsel %vm67_vm0, %v48_v30, 0  ;;  %v81_v37 = vsel %vm67_vm0, %v47_v34, 0  ;;  %v45_v42 = vpack.c.bf16 %v30_v40, %v29_v39  ;;  %v502_v44 = vld [vmem:[%s675_s1 + $0x8] sm:$0xff]   ;;  %v503_v45 = vld [vmem:[%s678_s3] sm:$0xff]  }
   0xb   :  { %v78_v41 = vsel %vm67_vm0, %v46_v38, 0  ;;  %475 = vmatprep.mubr.msk.bf16.mxu1 %vm231_vm1, %v503_v45  ;;  %v504_v9 = vld [vmem:[%s678_s3 + $0x8] sm:$0xff]   ;;  %v357_v31 = vld [vmem:[%s679_s5] sm:$0x1] }
   0xc   :  { %v75_v43 = vsel %vm67_vm0, %v45_v42, 0 }
   0xd   :  { %454 = vmatpush3.bf16.xpose.msra.mxu0 %v93_v14  ;;  %319 = vperm.xlu0 %499, %v291_v18  }
   0xe   :  { %489 = vmatprep.subr.msk.bf16.mxu0 %vm67_vm0, %v50_v15  ;;  %331 = vperm.xlu1 %500, %v292_v21  }
  0x11   :  { %295 = vperm.xlu0 %499, %v289_v24  }
  0x12   :  { %307 = vperm.xlu1 %500, %v290_v25  }
  0x15   :  { %456 = vmatpush3.bf16.xpose.msra.mxu0 %v90_v22  ;;  %361 = vperm.xlu0 %499, %v358_v26  }
  0x16   :  { %490 = vmatprep.subr.msk.bf16.mxu0 %vm67_vm0, %v49_v23 }
  0x1d   :  { %458 = vmatpush3.bf16.xpose.msra.mxu0 %v87_v29 }
  0x1e   :  { %491 = vmatprep.subr.msk.bf16.mxu0 %vm67_vm0, %v48_v30 }
  0x25   :  { %460 = vmatpush3.bf16.xpose.msra.mxu0 %v84_v33 }
  0x26   :  { %492 = vmatprep.subr.msk.bf16.mxu0 %vm67_vm0, %v47_v34 }
  0x2d   :  { %462 = vmatpush3.bf16.xpose.msra.mxu0 %v81_v37 }
  0x2e   :  { %493 = vmatprep.subr.msk.bf16.mxu0 %vm67_vm0, %v46_v38 }
  0x35   :  { %464 = vmatpush3.bf16.xpose.msra.mxu0 %v78_v41 }
  0x36   :  { %494 = vmatprep.subr.msk.bf16.mxu0 %vm67_vm0, %v45_v42 }
  0x3d   :  { %466 = vmatpush3.bf16.xpose.msra.mxu0 %v75_v43 }
  0x44   :  { %468 = vmatmul.mubr.msk.bf16.vlgmr.msra.gmra.mxu0 %vm67_vm0, %v502_v44 }
  0x80   :  { %v180_v51 = vpop.permute.xlu0 %179 }
  0x81   :  { %v156_v52 = vpop.permute.xlu1 %155  ;;  %v188_v56 = vrot.slane %v180_v51, %v163_v53 }
  0x82   :  { %v164_v60 = vrot.slane %v156_v52, %v163_v53 }
  0x84   :  { %v192_v54 = vpop.permute.xlu0 %191 }
  0x85   :  { %v200_v57 = vrot.slane %v192_v54, %v163_v53  ;;  %v168_v58 = vpop.permute.xlu1 %167 }
  0x86   :  { %v176_v61 = vrot.slane %v168_v58, %v163_v53 }
  0x87   :  { %v426_v63 = vcombine.low %v188_v56, %v200_v57 }
  0x88   :  { %v425_v2 = vcombine.low %v164_v60, %v176_v61  ;;  %v320_v12 = vpop.permute.xlu0 %319 }
  0x89   :  { %v332_v11 = vpop.permute.xlu1 %331  ;;  %v328_v15 = vrot.slane %v320_v12, %v163_v53 }
  0x8a   :  { %v340_v16 = vrot.slane %v332_v11, %v163_v53 }
  0x8c   :  { %v296_v17 = vpop.permute.xlu0 %295  ;;  %v432_v22 = vcombine.low %v328_v15, %v340_v16 }
  0x8d   :  { %v308_v13 = vpop.permute.xlu1 %307  ;;  %v304_v19 = vrot.slane %v296_v17, %v163_v53 }
  0x8e   :  { %v316_v20 = vrot.slane %v308_v13, %v163_v53 }
  0x90   :  { %v431_v25 = vcombine.low %v304_v19, %v316_v20  ;;  %v362_v33 = vpop.permute.xlu0 %361 }
  0x91   :  { %v367_v34 = vrot.slane %v362_v33, %v366_v32 }
 0x104   :  { %v469_v55 = vpop.f32.mrf.mxu0 }
 0x106   :  { %v132_v59 = vpop.f32.mrf.mxu0 }
 0x108   :  { %v470_v62 = vpop.f32.mrf.mxu0 }
 0x109   :  { %v148_v0 = vpack.c.bf16 %v470_v62, %v469_v55 }
 0x10a   :  { %v135_v1 = vpop.f32.mrf.mxu0 }
 0x10b   :  { %v214_v4 = vadd.bf16 %v426_v63, %v148_v0  ;;  %v147_v5 = vpack.c.bf16 %v135_v1, %v132_v59 }
 0x10d   :  { %v213_v6 = vadd.bf16 %v425_v2, %v147_v5  ;;  %v216_v7 = vmax.bf16 %v509_v3, %v214_v4 }
 0x10f   :  { %471 = vmatprep.subr.bf16.mxu1 %v216_v7  ;;  %v215_v8 = vmax.bf16 %v509_v3, %v213_v6 }
 0x110   :  { %472 = vmatpush3.bf16.msra.mxu1 %v216_v7 }
 0x111   :  { %473 = vmatprep.subr.bf16.mxu1 %v215_v8 }
 0x114   :  { %474 = vmatpush3.bf16.msra.mxu1 %v215_v8 }
 0x115   :  { %479 = vmatprep.subr.bf16.mxu1 %v511_v10 }
 0x117   :  { %476 = vmatmul.mubr.msk.bf16.vlgmr.msra.gmra.mxu1 %vm231_vm1, %v504_v9 }
 0x118   :  { %483 = vmatprep.mubr.msk.bf16.mxu1 %vm512_vm2, %v511_v10 }
 0x1d7   :  { %v477_v14 = vpop.f32.mrf.mxu1 }
 0x1d9   :  { %v272_v18 = vpop.f32.mrf.mxu1 }
 0x1db   :  { %v478_v21 = vpop.f32.mrf.mxu1 }
 0x1dc   :  { %v288_v23 = vpack.c.bf16 %v478_v21, %v477_v14 }
 0x1dd   :  { %v275_v24 = vpop.f32.mrf.mxu1 }
 0x1de   :  { %v354_v26 = vadd.bf16 %v432_v22, %v288_v23  ;;  %v287_v27 = vpack.c.bf16 %v275_v24, %v272_v18 }
 0x1e0   :  { %v356_v28 = vmax.bf16 %v509_v3, %v354_v26  ;;  %v353_v29 = vadd.bf16 %v431_v25, %v287_v27 }
 0x1e2   :  { %480 = vmatpush3.bf16.msra.mxu1 %v356_v28  ;;  %v355_v30 = vmax.bf16 %v509_v3, %v353_v29 }
 0x1e3   :  { %481 = vmatprep.subr.bf16.mxu1 %v511_v10 }
 0x1e6   :  { %482 = vmatpush3.bf16.msra.mxu1 %v355_v30 }
 0x1e9   :  { %484 = vmatmul.mubr.msk.bf16.vlgmr.msra.gmra.mxu1 %vm231_vm1, %v357_v31 }
 0x2a9   :  { %v405_v35 = vpop.f32.mrf.mxu1 }
 0x2aa   :  { %v406_v36 = vadd.f32 %v405_v35, %v367_v34 }
 0x2ab   :  { %v485_v37 = vpop.f32.mrf.mxu1 }
 0x2ac   :  { %v411_v38 = vsub.f32 0.0, %v406_v36 }
 0x2ad   :  { %v408_v39 = vpop.f32.mrf.mxu1 }
 0x2ae   :  { %v412_v40 = vmul.f32 1.442695, %v411_v38 }
 0x2af   :  { %v486_v41 = vpop.f32.mrf.mxu1 }
 0x2b0   :  { %505 = vpow2.f32 %v412_v40 }
 0x2bd   :  { %v506_v42 = vpop.eup %505 }
 0x2be   :  { %v414_v3 = vadd.f32 1.0, %v506_v42 }
 0x2c0   :  { %507 = vrcp.f32 %v414_v3 }
 0x2cd   :  { %v508_v43 = vpop.eup %507 }
 0x2ce   :  { %416 = vst [vmem:[%s680_s7] sm:$0x1] %v508_v43 }

</bundles_post_ra>
